<compile_context>
chip_gen: v6e
topology: v6e:2x2x1
jax: 0.10.0
libtpu: 0.0.40
codegen_flags: <defaults>
</compile_context>

<pallas_src>
import jax
import jax.numpy as jnp
import numpy as np
from jax.experimental import pallas as pl
from jax.experimental.pallas import tpu as pltpu


def _softmax_pool(scores, x, o_ref):
    """scores: (TB, S) f32 logits; x: (TB, S, H) f32; writes (TB, H) to o_ref."""
    scores = scores - jnp.max(scores, axis=-1, keepdims=True)      # (TB, S)
    e = jnp.exp(scores)                                            # EUP
    denom = jnp.sum(e, axis=-1, keepdims=True)                     # (TB, 1)
    pooled = jnp.sum(e[:, :, None] * x, axis=1)                    # (TB, H)
    # Fold the softmax denominator into the output scale: only TB divides
    # instead of S divides per row (exact divide kept for bit-accuracy;
    # pl.reciprocal(denom, approx=True) would also work if tolerance allows).
    o_ref[...] = (pooled * (1.0 / denom)).astype(o_ref.dtype)


def _attn_pool_kernel(x_ref, w_ref, o_ref):
    # x_ref: (TB, S, H) inputs tile; w_ref: (1, H) attention row; o_ref: (TB, H)
    x = x_ref[...].astype(jnp.float32)
    w = w_ref[...].astype(jnp.float32)
    scores = jnp.sum(x * w[None, :, :], axis=-1)                   # (TB, S)
    _softmax_pool(scores, x, o_ref)


def _attn_pool_kernel_masked(x_ref, w_ref, m_ref, o_ref):
    # m_ref: (TB, S) float mask, 1.0 = keep, 0.0 = masked out.
    x = x_ref[...].astype(jnp.float32)
    w = w_ref[...].astype(jnp.float32)
    m = m_ref[...]
    scores = jnp.sum(x * w[None, :, :], axis=-1)                   # (TB, S)
    scores = scores - 999.0 * (1.0 - m)      # faithful to the PyTorch module
    _softmax_pool(scores, x, o_ref)


def _choose_batch_tile(batch, seq, hidden, itemsize,
                       target_bytes=2 << 20, max_rows=256):
    """Batch rows processed per grid step.

    Sized so the (double-buffered) input tile is MiB-scale, capped at
    `max_rows`, kept a multiple of 8 so the 2-D (TB, S) / (TB, H) blocks
    satisfy the (8, 128) sublane tiling rule, and reduced to leave >= 2 grid
    steps when the batch allows it (v7x dual TensorCore / megacore sharding).
    """
    per_row = max(1, seq * hidden * itemsize)
    tb = max(1, min(max_rows, target_bytes // per_row, batch))
    if batch >= 16 and 2 * tb > batch:
        tb = (batch + 1) // 2
    return ((tb + 7) // 8) * 8


def attention_encoding(inputs, weight, bias=None, mask=None):
    """inputs: (B, S, H); weight: (H,) = Linear(H,1).weight row; mask: (B, S) bool or None.

    `bias` is accepted for API parity but ignored: softmax over the sequence
    axis is shift-invariant, so the scalar bias has exactly zero effect.
    """
    del bias
    B, S, H = inputs.shape
    out_dtype = inputs.dtype
    itemsize = jnp.dtype(inputs.dtype).itemsize

    tb = _choose_batch_tile(B, S, H, itemsize)
    num_tiles = -(-B // tb)
    b_padded = num_tiles * tb

    x = inputs
    if b_padded != B:
        x = jnp.concatenate(
            [x, jnp.zeros((b_padded - B, S, H), inputs.dtype)], axis=0)

    w2d = jnp.asarray(weight, jnp.float32).reshape(1, H)

    # Tiles are ~2 MiB per buffer -> comfortably under the 32 MiB default
    # scoped VMEM and v7x's 64 MiB physical VMEM; only raise the limit for
    # unusually large S*H where even an 8-row tile is big.
    est_vmem = 2 * tb * S * H * itemsize + 2 * tb * (S + H) * 4 + H * 4
    vmem_limit = min(int(est_vmem * 2), 96 << 20) if est_vmem > (24 << 20) else None
    cparams = pltpu.CompilerParams(
        dimension_semantics=("parallel",), vmem_limit_bytes=vmem_limit)

    x_spec = pl.BlockSpec((tb, S, H), lambda b: (b, 0, 0))
    w_spec = pl.BlockSpec((1, H), lambda b: (0, 0))
    o_spec = pl.BlockSpec((tb, H), lambda b: (b, 0))
    out_shape = jax.ShapeDtypeStruct((b_padded, H), out_dtype)

    if mask is None:
        # Dedicated no-mask variant: zero mask bytes ever leave HBM.
        out = pl.pallas_call(
            _attn_pool_kernel,
            out_shape=out_shape,
            grid_spec=pltpu.PrefetchScalarGridSpec(
                num_scalar_prefetch=0, grid=(num_tiles,),
                in_specs=[x_spec, w_spec], out_specs=o_spec),
            compiler_params=cparams,
        )(x, w2d)
    else:
        m = jnp.asarray(mask, jnp.float32)
        if b_padded != B:
            m = jnp.concatenate(
                [m, jnp.ones((b_padded - B, S), jnp.float32)], axis=0)
        m_spec = pl.BlockSpec((tb, S), lambda b: (b, 0))
        out = pl.pallas_call(
            _attn_pool_kernel_masked,
            out_shape=out_shape,
            grid_spec=pltpu.PrefetchScalarGridSpec(
                num_scalar_prefetch=0, grid=(num_tiles,),
                in_specs=[x_spec, w_spec, m_spec], out_specs=o_spec),
            compiler_params=cparams,
        )(x, w2d, m)

    return out[:B]


def attention_encoding_ref(inputs, weight, bias, mask=None):
    """Pure-JAX reference in exact f32 (explicit mul+reduce, no TPU bf16 dot)."""
    x = inputs.astype(jnp.float32)
    a = jnp.sum(x * weight[None, None, :], axis=-1) + bias          # (B, S)
    if mask is not None:
        a = a - 999.0 * (1.0 - mask.astype(jnp.float32))
    a = jax.nn.softmax(a, axis=-1)
    return jnp.sum(a[:, :, None] * x, axis=1)                       # (B, H)


if __name__ == "__main__":
    key = jax.random.PRNGKey(0)

    # Small config (matches the module at toy sizes) + one config that
    # exercises batch padding and a multi-row tile.
    for (B, S, H) in [(2, 8, 32), (12, 16, 128)]:
        key, kx, kw, kb, km = jax.random.split(key, 5)
        inputs = jax.random.normal(kx, (B, S, H), dtype=jnp.float32)
        bound = 1.0 / float(np.sqrt(H))   # nn.Linear(H, 1) default init range
        weight = jax.random.uniform(kw, (H,), jnp.float32, -bound, bound)
        bias = jax.random.uniform(kb, (), jnp.float32, -bound, bound)
        mask = jax.random.bernoulli(km, 0.8, (B, S))
        mask = mask.at[:, 0].set(True)    # at least one valid position per row

        out_m = jax.block_until_ready(
            attention_encoding(inputs, weight, bias, mask))
        ref_m = attention_encoding_ref(inputs, weight, bias, mask)
        np.testing.assert_allclose(np.asarray(out_m), np.asarray(ref_m),
                                   rtol=1e-5, atol=1e-5)

        out_nm = jax.block_until_ready(
            attention_encoding(inputs, weight, bias, None))
        ref_nm = attention_encoding_ref(inputs, weight, bias, None)
        np.testing.assert_allclose(np.asarray(out_nm), np.asarray(ref_nm),
                                   rtol=1e-5, atol=1e-5)

    print("KERNEL_OK")
</pallas_src>

<mosaic_0001>
module attributes {stable_mosaic.version = 11 : i64} {
  func.func @_attn_pool_kernel_masked(%arg0: i32, %arg1: memref<8x8x32xf32, #tpu.memory_space<vmem>>, %arg2: memref<1x32xf32, #tpu.memory_space<vmem>>, %arg3: memref<8x8xf32, #tpu.memory_space<vmem>>, %arg4: memref<8x32xf32, #tpu.memory_space<vmem>>) attributes {dimension_semantics = [#tpu.dimension_semantics<parallel>], iteration_bounds = array<i64: 1>, scalar_prefetch = 0 : i64, scratch_operands = 0 : i64, tpu.core_type = #tpu.core_type<tc>, window_params = [{transform_indices = @transform_0, window_bounds = array<i64: 8, 8, 32>}, {pipeline_mode = #tpu.pipeline_mode<synchronous>, transform_indices = @transform_1, window_bounds = array<i64: 1, 32>}, {transform_indices = @transform_2, window_bounds = array<i64: 8, 8>}, {transform_indices = @transform_3, window_bounds = array<i64: 8, 32>}]} {
    %c0 = arith.constant 0 : index
    %c0_0 = arith.constant 0 : index
    %c0_1 = arith.constant 0 : index
    %0 = vector.load %arg1[%c0, %c0_0, %c0_1] : memref<8x8x32xf32, #tpu.memory_space<vmem>>, vector<8x8x32xf32>
    %c0_2 = arith.constant 0 : index
    %c0_3 = arith.constant 0 : index
    %1 = vector.load %arg2[%c0_2, %c0_3] : memref<1x32xf32, #tpu.memory_space<vmem>>, vector<1x32xf32>
    %c0_4 = arith.constant 0 : index
    %c0_5 = arith.constant 0 : index
    %2 = vector.load %arg3[%c0_4, %c0_5] : memref<8x8xf32, #tpu.memory_space<vmem>>, vector<8x8xf32>
    %3 = vector.shape_cast %1 : vector<1x32xf32> to vector<1x1x32xf32>
    %4 = vector.broadcast %3 : vector<1x1x32xf32> to vector<8x8x32xf32>
    %5 = arith.mulf %0, %4 : vector<8x8x32xf32>
    %cst = arith.constant dense<0.000000e+00> : vector<8x8xf32>
    %6 = vector.multi_reduction <add>, %5, %cst [2] : vector<8x8x32xf32> to vector<8x8xf32>
    %cst_6 = arith.constant 1.000000e+00 : f32
    %7 = vector.broadcast %cst_6 : f32 to vector<8x8xf32>
    %8 = arith.subf %7, %2 : vector<8x8xf32>
    %cst_7 = arith.constant 9.990000e+02 : f32
    %9 = vector.broadcast %cst_7 : f32 to vector<8x8xf32>
    %10 = arith.mulf %9, %8 : vector<8x8xf32>
    %11 = arith.subf %6, %10 : vector<8x8xf32>
    %cst_8 = arith.constant dense<0xFF800000> : vector<8xf32>
    %12 = vector.multi_reduction <maximumf>, %11, %cst_8 [1] : vector<8x8xf32> to vector<8xf32>
    %13 = vector.shape_cast %12 : vector<8xf32> to vector<8x1xf32>
    %14 = vector.broadcast %13 : vector<8x1xf32> to vector<8x8xf32>
    %15 = arith.subf %11, %14 : vector<8x8xf32>
    %16 = math.exp %15 : vector<8x8xf32>
    %cst_9 = arith.constant dense<0.000000e+00> : vector<8xf32>
    %17 = vector.multi_reduction <add>, %16, %cst_9 [1] : vector<8x8xf32> to vector<8xf32>
    %18 = vector.shape_cast %17 : vector<8xf32> to vector<8x1xf32>
    %19 = vector.shape_cast %16 : vector<8x8xf32> to vector<8x8x1xf32>
    %20 = vector.broadcast %19 : vector<8x8x1xf32> to vector<8x8x32xf32>
    %21 = arith.mulf %20, %0 : vector<8x8x32xf32>
    %cst_10 = arith.constant dense<0.000000e+00> : vector<8x32xf32>
    %22 = vector.multi_reduction <add>, %21, %cst_10 [1] : vector<8x8x32xf32> to vector<8x32xf32>
    %cst_11 = arith.constant 1.000000e+00 : f32
    %23 = vector.broadcast %cst_11 : f32 to vector<8x1xf32>
    %24 = arith.divf %23, %18 : vector<8x1xf32>
    %25 = vector.broadcast %24 : vector<8x1xf32> to vector<8x32xf32>
    %26 = arith.mulf %22, %25 : vector<8x32xf32>
    %c0_12 = arith.constant 0 : index
    %c0_13 = arith.constant 0 : index
    %27 = vector.load %arg4[%c0_12, %c0_13] : memref<8x32xf32, #tpu.memory_space<vmem>>, vector<8x32xf32>
    tpu.vector_store %arg4[%c0_12, %c0_13], %26 {strides = array<i32>} : memref<8x32xf32, #tpu.memory_space<vmem>>, vector<8x32xf32>,
    return
  }
  func.func @transform_0(%arg0: i32) -> (i32, i32, i32) {
    %c0_i32 = arith.constant 0 : i32
    %c0_i32_0 = arith.constant 0 : i32
    %c0_i32_1 = arith.constant 0 : i32
    return %arg0, %c0_i32, %c0_i32_0 : i32, i32, i32
  }
  func.func @transform_1(%arg0: i32) -> (i32, i32) {
    %c0_i32 = arith.constant 0 : i32
    %c0_i32_0 = arith.constant 0 : i32
    %c0_i32_1 = arith.constant 0 : i32
    return %c0_i32, %c0_i32_0 : i32, i32
  }
  func.func @transform_2(%arg0: i32) -> (i32, i32) {
    %c0_i32 = arith.constant 0 : i32
    %c0_i32_0 = arith.constant 0 : i32
    return %arg0, %c0_i32 : i32, i32
  }
  func.func @transform_3(%arg0: i32) -> (i32, i32) {
    %c0_i32 = arith.constant 0 : i32
    %c0_i32_0 = arith.constant 0 : i32
    return %arg0, %c0_i32 : i32, i32
  }
}

</mosaic_0001>

<bundles_post_ra>
// kernel: tpu_custom_call.1
= control target key start
LH: loop header
LB: loop body
LE: loop exit
PB: predicated region body
PF: predicated region fallthrough
CT: control target
= control target key end

     0   :  { %8 = vsyncpa [#allocation3], 0  ;;  %s820_s0 = inlined_call_operand.hbm [shape: f32[8,8,32], index: 0, kind: input, shape index: {}]   ;;  %s821_s1 = inlined_call_operand.vmem [shape: f32[1,32], index: 1, kind: input, shape index: {}]   ;;  %s822_s2 = inlined_call_operand.hbm [shape: f32[8,8], index: 2, kind: input, shape index: {}]   ;;  %s823_s3 = inlined_call_operand.hbm [shape: f32[8,32], index: 3, kind: output, shape index: {}]  }
   0x1   :  { %9 = vsyncpa [#allocation6], 0 }
   0x2   :  { %10 = vsyncpa [#allocation4], 0  ;;  %s621_s12 = smov [#allocation2]  }
   0x3   :  { %s16_s13 = sshll.u32 %s621_s12, 4  ;;  %s17_s13 = int_to_ptr.vmem [resolvable:$true] %s16_s13 }
   0x4   :  { %s563_s14 = scalar_lea.vmem %s17_s13, 1024  ;;  %p568_p1 = scmp.lt.s32.totalorder %s17_s13, %s17_s13 }
   0x5   :  { %p564_p0 = scmp.ne.s32.totalorder %s17_s13, %s563_s14  ;;  %p569_p2 = scmp.lt.s32.totalorder %s563_s14, %s563_s14 }
   0x7   :  { %p570_p3 = por %p569_p2, %p568_p1 }
   0x9   :  { %p571_p4 = pnand %p570_p3, %p564_p0 }
   0xb   :  { %574 = shalt.err (!%p571_p4)
}
   0xc   :  { %s622_s15 = smov 128   ;;  %s623_s16 = smov 8  }
   0xd   :  { %22 = dma.hbm_to_vmem [thread:$0]  %s820_s0, 1024, %s17_s13, [#allocation3], %s622_s15, %s622_s15, %s623_s16  }
   0xe   :  { %s624_s19 = smov [#allocation5]  }
   0xf   :  { %s31_s20 = sshll.u32 %s624_s19, 4  ;;  %s32_s20 = int_to_ptr.vmem [resolvable:$true] %s31_s20 }
  0x10   :  { %s583_s21 = scalar_lea.vmem %s32_s20, 128  ;;  %p588_p6 = scmp.lt.s32.totalorder %s32_s20, %s32_s20 }
  0x11   :  { %p584_p5 = scmp.ne.s32.totalorder %s32_s20, %s583_s21  ;;  %p589_p7 = scmp.lt.s32.totalorder %s583_s21, %s583_s21 }
  0x13   :  { %p590_p8 = por %p589_p7, %p588_p6 }
  0x15   :  { %p591_p9 = pnand %p590_p8, %p584_p5 }
  0x17   :  { %594 = shalt.err (!%p591_p9)
}
  0x18   :  { %34 = dma.hbm_to_vmem [thread:$0]  %s822_s2, 128, %s32_s20, [#allocation6]  }
  0x19   :  { %615 = dma.done.wait [#allocation3], 1024  }
  0x1a   :  { %616 = vsyncadd [#allocation3], 4294966272 }
  0x1b   :  { %617 = dma.done.wait [#allocation6], 128  }
  0x1c   :  { %618 = vsyncadd [#allocation6], 4294967168  ;;  %v93_v0 = vlaneseq  ;;  %v658_v4 = vld [vmem:[#allocation2 + $0x10] sm:$0xff]  ;;  %v528_v5 = vld [vmem:[%s821_s1] ss:$0 sm:$0xff]  ;;  %vm65_vm0 = vcmask 261120  }
  0x1d   :  { %v663_v6 = vld [vmem:[#allocation2] sm:$0xff]  ;;  %v59_v7 = vmul.f32 %v528_v5, %v658_v4  ;;  %v667_v9 = vld [vmem:[#allocation2 + $0x18] sm:$0xff]  ;;  %v669_v10 = vld [vmem:[#allocation2 + $0x8] sm:$0xff]  ;;  %v625_v36 = vmov 0   ;;  %vm231_vm1 = vcmask 1041409   ;;  %vm233_vm2 = vcmask 1042434  }
  0x1e   :  { %v653_v1 = vshrl.u32 %v93_v0, 7  ;;  %v198_v2 = vand.u32 127, %v93_v0  ;;  %v57_v8 = vmul.f32 %v528_v5, %v663_v6  ;;  %v60_v11 = vmul.f32 %v528_v5, %v667_v9  ;;  %v673_v13 = vld [vmem:[#allocation2 + $0x28] sm:$0xff]  ;;  %v675_v14 = vld [vmem:[#allocation2 + $0x20] sm:$0xff]  ;;  %v683_v21 = vld [vmem:[#allocation2 + $0x38] sm:$0xff]  ;;  %536 = vset.pattern.permute.xlu1 %v625_v36  ;;  %535 = vset.pattern.permute.xlu0 %v625_v36  ;;  %s626_s1 = smov [#allocation7]  }
  0x1f   :  { %v58_v12 = vmul.f32 %v528_v5, %v669_v10  ;;  %v72_v15 = vsel %vm65_vm0, %v59_v7, 0.0  ;;  %v62_v19 = vmul.f32 %v528_v5, %v673_v13  ;;  %v61_v20 = vmul.f32 %v528_v5, %v675_v14  ;;  %v685_v22 = vld [vmem:[#allocation2 + $0x30] sm:$0xff]  ;;  %v50_v29 = vld [vmem:[#allocation5] sm:$0xff]  ;;  %s518_s2 = sshll.u32 %s626_s1, 4  ;;  %s519_s2 = int_to_ptr.vmem [resolvable:$true] %s518_s2 }
  0x20   :  { %v656_v3 = vsub.s32 %v198_v2, %v653_v1  ;;  %v66_v16 = vsel %vm65_vm0, %v57_v8, 0.0  ;;  %73 = vadd.xlane.f32.xlu1 %v72_v15  ;;  %v75_v17 = vsel %vm65_vm0, %v60_v11, 0.0  ;;  %v64_v25 = vmul.f32 %v528_v5, %v683_v21  ;;  %s595_s25 = scalar_lea.vmem %s519_s2, 128  ;;  %p600_p11 = scmp.lt.s32.totalorder %s519_s2, %s519_s2 }
  0x21   :  { %67 = vadd.xlane.f32.xlu0 %v66_v16  ;;  %v69_v18 = vsel %vm65_vm0, %v58_v12, 0.0  ;;  %v81_v23 = vsel %vm65_vm0, %v62_v19, 0.0  ;;  %v78_v24 = vsel %vm65_vm0, %v61_v20, 0.0  ;;  %v63_v26 = vmul.f32 %v528_v5, %v685_v22  ;;  %p596_p10 = scmp.ne.s32.totalorder %s519_s2, %s595_s25  ;;  %p601_p12 = scmp.lt.s32.totalorder %s595_s25, %s595_s25 }
  0x22   :  { %v87_v27 = vsel %vm65_vm0, %v64_v25, 0.0  ;;  %v90_v30 = vsub.f32 1.0, %v50_v29  ;;  %v102_v32 = vsub.s32 1, %v653_v1  ;;  %v109_v34 = vsub.s32 2, %v653_v1 }
  0x23   :  { %v84_v28 = vsel %vm65_vm0, %v63_v26, 0.0  ;;  %v95_v35 = vsub.s32 0, %v653_v1  ;;  %v116_v38 = vsub.s32 3, %v653_v1  ;;  %v123_v40 = vsub.s32 4, %v653_v1  ;;  %p602_p13 = por %p601_p12, %p600_p11 }
  0x24   :  { %76 = vadd.xlane.f32.xlu1 %v75_v17  ;;  %v91_v31 = vmul.f32 999.0, %v90_v30  ;;  %v130_v42 = vsub.s32 5, %v653_v1  ;;  %v137_v44 = vsub.s32 6, %v653_v1  ;;  %v144_v46 = vsub.s32 7, %v653_v1 }
  0x25   :  { %70 = vadd.xlane.f32.xlu0 %v69_v18  ;;  %vm235_vm3 = vcmask 1043459   ;;  %vm237_vm4 = vcmask 1044484   ;;  %vm239_vm5 = vcmask 1045509   ;;  %vm241_vm6 = vcmask 1046534   ;;  %p603_p0 = pnand %p602_p13, %p596_p10 }
  0x26   :  { %v103_v33 = vrot.slane %v91_v31, %v102_v32  ;;  %v110_v37 = vrot.slane %v91_v31, %v109_v34  ;;  %v96_v39 = vrot.slane %v91_v31, %v95_v35  ;;  %v117_v41 = vrot.slane %v91_v31, %v116_v38 }
  0x27   :  { %v124_v43 = vrot.slane %v91_v31, %v123_v40  ;;  %v131_v45 = vrot.slane %v91_v31, %v130_v42  ;;  %v138_v47 = vrot.slane %v91_v31, %v137_v44  ;;  %v145_v48 = vrot.slane %v91_v31, %v144_v46 }
  0x28   :  { %82 = vadd.xlane.f32.xlu1 %v81_v23  ;;  %vm243_vm7 = vcmask 1047559   ;;  %vm246_vm8 = vcmask 64512  }
  0x29   :  { %79 = vadd.xlane.f32.xlu0 %v78_v24 }
  0x2c   :  { %88 = vadd.xlane.f32.xlu1 %v87_v27 }
  0x2d   :  { %85 = vadd.xlane.f32.xlu0 %v84_v28 }
  0x3d   :  { %105 = vbcast.lane.b32.xlu1 %v103_v33, 256 }
  0x41   :  { %112 = vbcast.lane.b32.xlu1 %v110_v37, 256 }
  0x43   :  { %98 = vbcast.lane.b32.xlu0 %v96_v39, 256 }
  0x45   :  { %119 = vbcast.lane.b32.xlu1 %v117_v41, 256 }
  0x47   :  { %126 = vbcast.lane.b32.xlu0 %v124_v43, 256 }
  0x49   :  { %133 = vbcast.lane.b32.xlu1 %v131_v45, 256 }
  0x4b   :  { %140 = vbcast.lane.b32.xlu0 %v138_v47, 256 }
  0x4d   :  { %147 = vbcast.lane.b32.xlu1 %v145_v48, 256 }
  0xa9   :  { %v74_v49 = vpop.xlane.xlu1 %73 }
  0xaa   :  { %v68_v50 = vpop.xlane.xlu0 %67 }
  0xad   :  { %v77_v51 = vpop.xlane.xlu1 %76 }
  0xae   :  { %v71_v52 = vpop.xlane.xlu0 %70 }
  0xb1   :  { %v83_v53 = vpop.xlane.xlu1 %82 }
  0xb2   :  { %v80_v54 = vpop.xlane.xlu0 %79 }
  0xb5   :  { %v89_v55 = vpop.xlane.xlu1 %88 }
  0xb6   :  { %v86_v56 = vpop.xlane.xlu0 %85 }
  0xb9   :  { %v106_v57 = vpop.permute.xlu1 %105 }
  0xba   :  { %v99_v58 = vpop.permute.xlu0 %98  ;;  %v717_v59 = vsub.f32 %v71_v52, %v106_v57 }
  0xbb   :  { %v157_v60 = vsub.f32 %v68_v50, %v99_v58 }
  0xbc   :  { %177 = vperm.xlu1 %536, %v717_v59  }
  0xbd   :  { %174 = vperm.xlu0 %535, %v157_v60   ;;  %v113_v61 = vpop.permute.xlu1 %112 }
  0xbe   :  { %v127_v62 = vpop.permute.xlu0 %126  ;;  %v720_v63 = vsub.f32 %v74_v49, %v113_v61 }
  0xbf   :  { %v723_v2 = vsub.f32 %v80_v54, %v127_v62 }
  0xc0   :  { %180 = vperm.xlu1 %536, %v720_v63  }
  0xc1   :  { %v120_v0 = vpop.permute.xlu1 %119 }
  0xc2   :  { %v725_v5 = vsub.f32 %v77_v51, %v120_v0  ;;  %v141_v7 = vpop.permute.xlu0 %140 }
  0xc3   :  { %v729_v11 = vsub.f32 %v86_v56, %v141_v7 }
  0xc4   :  { %183 = vperm.xlu0 %535, %v725_v5   ;;  %186 = vperm.xlu1 %536, %v723_v2  }
  0xc5   :  { %v134_v8 = vpop.permute.xlu1 %133 }
  0xc6   :  { %v731_v12 = vsub.f32 %v83_v53, %v134_v8 }
  0xc8   :  { %189 = vperm.xlu0 %535, %v731_v12   ;;  %192 = vperm.xlu1 %536, %v729_v11  }
  0xc9   :  { %v148_v15 = vpop.permute.xlu1 %147 }
  0xca   :  { %v735_v16 = vsub.f32 %v89_v55, %v148_v15 }
  0xcc   :  { %195 = vperm.xlu0 %535, %v735_v16  }
 0x137   :  { %v178_v17 = vpop.permute.xlu1 %177 }
 0x138   :  { %v175_v18 = vpop.permute.xlu0 %174  ;;  %v206_v20 = vrot.slane %v178_v17, %v656_v3 }
 0x139   :  { %v202_v23 = vrot.slane %v175_v18, %v656_v3 }
 0x13b   :  { %v181_v19 = vpop.permute.xlu1 %180  ;;  %v232_v27 = vsel %vm231_vm1, %v206_v20, %v202_v23 }
 0x13c   :  { %v210_v24 = vrot.slane %v181_v19, %v656_v3 }
 0x13e   :  { %v234_v29 = vsel %vm233_vm2, %v210_v24, %v232_v27 }
 0x13f   :  { %v187_v25 = vpop.permute.xlu1 %186  ;;  %v184_v26 = vpop.permute.xlu0 %183 }
 0x140   :  { %v214_v28 = vrot.slane %v184_v26, %v656_v3  ;;  %v218_v30 = vrot.slane %v187_v25, %v656_v3 }
 0x142   :  { %v236_v31 = vsel %vm235_vm3, %v214_v28, %v234_v29 }
 0x143   :  { %v193_v33 = vpop.permute.xlu1 %192  ;;  %v190_v36 = vpop.permute.xlu0 %189  ;;  %v238_v41 = vsel %vm237_vm4, %v218_v30, %v236_v31 }
 0x144   :  { %v222_v37 = vrot.slane %v190_v36, %v656_v3  ;;  %v226_v39 = vrot.slane %v193_v33, %v656_v3 }
 0x146   :  { %v240_v43 = vsel %vm239_vm5, %v222_v37, %v238_v41 }
 0x147   :  { %v196_v45 = vpop.permute.xlu0 %195  ;;  %v242_v48 = vsel %vm241_vm6, %v226_v39, %v240_v43 }
 0x148   :  { %v230_v47 = vrot.slane %v196_v45, %v656_v3 }
 0x14a   :  { %v244_v49 = vsel %vm243_vm7, %v230_v47, %v242_v48 }
 0x14b   :  { %v247_v50 = vsel %vm246_vm8, %v244_v49, -inf }
 0x14c   :  { %248 = vmax.xlane.f32.xlu1 %v247_v50 }
 0x1d5   :  { %v249_v51 = vpop.xlane.xlu1 %248 }
 0x1d6   :  { %v254_v52 = vrot.slane %v249_v51, %v95_v35  ;;  %v258_v53 = vrot.slane %v249_v51, %v102_v32  ;;  %v262_v54 = vrot.slane %v249_v51, %v109_v34  ;;  %v266_v58 = vrot.slane %v249_v51, %v116_v38 }
 0x1d7   :  { %v270_v35 = vrot.slane %v249_v51, %v123_v40  ;;  %v274_v34 = vrot.slane %v249_v51, %v130_v42  ;;  %v278_v38 = vrot.slane %v249_v51, %v137_v44  ;;  %v282_v40 = vrot.slane %v249_v51, %v144_v46 }
 0x1d8   :  { %v291_v55 = vsub.f32 %v157_v60, %v254_v52  ;;  %v292_v56 = vsub.f32 %v717_v59, %v258_v53  ;;  %v293_v61 = vsub.f32 %v720_v63, %v262_v54  ;;  %v294_v0 = vsub.f32 %v725_v5, %v266_v58 }
 0x1d9   :  { %v295_v59 = vsub.f32 %v723_v2, %v270_v35  ;;  %v296_v63 = vsub.f32 %v731_v12, %v274_v34  ;;  %v297_v5 = vsub.f32 %v729_v11, %v278_v38  ;;  %v298_v2 = vsub.f32 %v735_v16, %v282_v40 }
 0x1da   :  { %v299_v57 = vmul.f32 1.442695, %v291_v55  ;;  %v301_v62 = vmul.f32 1.442695, %v292_v56  ;;  %v303_v32 = vmul.f32 1.442695, %v293_v61 }
 0x1db   :  { %v305_v60 = vmul.f32 1.442695, %v294_v0  ;;  %v307_v7 = vmul.f32 1.442695, %v295_v59  ;;  %v309_v42 = vmul.f32 1.442695, %v296_v63 }
 0x1dc   :  { %537 = vpow2.f32 %v299_v57  ;;  %v311_v17 = vmul.f32 1.442695, %v297_v5  ;;  %v313_v12 = vmul.f32 1.442695, %v298_v2 }
 0x1dd   :  { %539 = vpow2.f32 %v301_v62 }
 0x1de   :  { %541 = vpow2.f32 %v303_v32 }
 0x1df   :  { %543 = vpow2.f32 %v305_v60 }
 0x1e0   :  { %545 = vpow2.f32 %v307_v7 }
 0x1e1   :  { %547 = vpow2.f32 %v309_v42 }
 0x1e2   :  { %549 = vpow2.f32 %v311_v17 }
 0x1e3   :  { %551 = vpow2.f32 %v313_v12 }
 0x1e9   :  { %v538_v8 = vpop.eup %537 }
 0x1ea   :  { %324 = vperm.xlu0 %535, %v538_v8   ;;  %v540_v15 = vpop.eup %539 }
 0x1eb   :  { %v542_v44 = vpop.eup %541 }
 0x1ec   :  { %v544_v18 = vpop.eup %543 }
 0x1ed   :  { %v546_v19 = vpop.eup %545 }
 0x1ee   :  { %327 = vperm.xlu0 %535, %v540_v15   ;;  %v548_v1 = vpop.eup %547 }
 0x1ef   :  { %v550_v46 = vpop.eup %549 }
 0x1f0   :  { %v552_v11 = vpop.eup %551 }
 0x1f2   :  { %330 = vperm.xlu0 %535, %v542_v44  }
 0x1f6   :  { %333 = vperm.xlu0 %535, %v544_v18  }
 0x1fa   :  { %336 = vperm.xlu0 %535, %v546_v19  }
 0x1fe   :  { %339 = vperm.xlu0 %535, %v548_v1  }
 0x202   :  { %342 = vperm.xlu0 %535, %v550_v46  }
 0x206   :  { %345 = vperm.xlu0 %535, %v552_v11  }
 0x265   :  { %v325_v20 = vpop.permute.xlu0 %324 }
 0x266   :  { %v350_v29 = vrot.slane %v325_v20, %v656_v3  ;;  %v398_v53 = vmul.f32 %v325_v20, %v663_v6 }
 0x268   :  { %v406_v58 = vsel %vm65_vm0, %v398_v53, 0.0 }
 0x269   :  { %v328_v23 = vpop.permute.xlu0 %327  ;;  %v407_v0 = vrot.slane %v406_v58, 4 }
 0x26a   :  { %v354_v27 = vrot.slane %v328_v23, %v656_v3  ;;  %v399_v54 = vmul.f32 %v328_v23, %v669_v10 }
 0x26b   :  { %v408_v63 = vadd.f32 %v407_v0, %v406_v58 }
 0x26c   :  { %v379_v36 = vsel %vm231_vm1, %v354_v27, %v350_v29  ;;  %v413_v61 = vsel %vm65_vm0, %v399_v54, 0.0 }
 0x26d   :  { %v331_v16 = vpop.permute.xlu0 %330  ;;  %v409_v2 = vrot.slane %v408_v63, 2 }
 0x26e   :  { %v358_v28 = vrot.slane %v331_v16, %v656_v3  ;;  %v400_v55 = vmul.f32 %v331_v16, %v658_v4  ;;  %v414_v4 = vrot.slane %v413_v61, 4 }
 0x26f   :  { %v410_v11 = vadd.f32 %v409_v2, %v408_v63 }
 0x270   :  { %v380_v39 = vsel %vm233_vm2, %v358_v28, %v379_v36  ;;  %v420_v62 = vsel %vm65_vm0, %v400_v55, 0.0  ;;  %v415_v7 = vadd.f32 %v414_v4, %v413_v61 }
 0x271   :  { %v334_v24 = vpop.permute.xlu0 %333  ;;  %v421_v32 = vrot.slane %v420_v62, 4  ;;  %v411_v28 = vrot.slane %v410_v11, 1 }
 0x272   :  { %v362_v30 = vrot.slane %v334_v24, %v656_v3  ;;  %v401_v56 = vmul.f32 %v334_v24, %v667_v9  ;;  %v416_v17 = vrot.slane %v415_v7, 2 }
 0x273   :  { %v422_v8 = vadd.f32 %v421_v32, %v420_v62 }
 0x274   :  { %v381_v43 = vsel %vm235_vm3, %v362_v30, %v380_v39  ;;  %v427_v35 = vsel %vm65_vm0, %v401_v56, 0.0  ;;  %v417_v20 = vadd.f32 %v416_v17, %v415_v7 }
 0x275   :  { %v337_v25 = vpop.permute.xlu0 %336  ;;  %v423_v44 = vrot.slane %v422_v8, 2 }
 0x276   :  { %v366_v31 = vrot.slane %v337_v25, %v656_v3  ;;  %v402_v57 = vmul.f32 %v337_v25, %v675_v14  ;;  %v418_v29 = vrot.slane %v417_v20, 1 }
 0x277   :  { %v424_v23 = vadd.f32 %v423_v44, %v422_v8 }
 0x278   :  { %v382_v45 = vsel %vm237_vm4, %v366_v31, %v381_v43  ;;  %v434_v9 = vsel %vm65_vm0, %v402_v57, 0.0  ;;  %v419_v43 = vadd.f32 %v418_v29, %v417_v20 }
 0x279   :  { %v340_v26 = vpop.permute.xlu0 %339  ;;  %v435_v60 = vrot.slane %v434_v9, 4  ;;  %v425_v30 = vrot.slane %v424_v23, 1 }
 0x27a   :  { %v370_v37 = vrot.slane %v340_v26, %v656_v3 }
 0x27b   :  { %v436_v5 = vadd.f32 %v435_v60, %v434_v9 }
 0x27c   :  { %v383_v49 = vsel %vm239_vm5, %v370_v37, %v382_v45 }
 0x27d   :  { %v343_v33 = vpop.permute.xlu0 %342  ;;  %v437_v1 = vrot.slane %v436_v5, 2 }
 0x27e   :  { %v374_v41 = vrot.slane %v343_v33, %v656_v3  ;;  %v404_v6 = vmul.f32 %v343_v33, %v685_v22 }
 0x280   :  { %v384_v50 = vsel %vm241_vm6, %v374_v41, %v383_v49  ;;  %v448_v34 = vsel %vm65_vm0, %v404_v6, 0.0  ;;  %v412_v41 = vadd.f32 %v411_v28, %v410_v11 }
 0x281   :  { %v346_v47 = vpop.permute.xlu0 %345  ;;  %v449_v40 = vrot.slane %v448_v34, 4 }
 0x282   :  { %v378_v48 = vrot.slane %v346_v47, %v656_v3  ;;  %v403_v3 = vmul.f32 %v340_v26, %v673_v13  ;;  %v405_v10 = vmul.f32 %v346_v47, %v683_v21  ;;  %v428_v13 = vrot.slane %v427_v35, 4 }
 0x283   :  { %v450_v18 = vadd.f32 %v449_v40, %v448_v34  ;;  %v438_v26 = vadd.f32 %v437_v1, %v436_v5  ;;  %v426_v47 = vadd.f32 %v425_v30, %v424_v23 }
 0x284   :  { %v385_v51 = vsel %vm243_vm7, %v378_v48, %v384_v50  ;;  %v441_v14 = vsel %vm65_vm0, %v403_v3, 0.0  ;;  %v455_v59 = vsel %vm65_vm0, %v405_v10, 0.0  ;;  %v429_v22 = vadd.f32 %v428_v13, %v427_v35 }
 0x285   :  { %v387_v52 = vsel %vm246_vm8, %v385_v51, 0.0  ;;  %v442_v38 = vrot.slane %v441_v14, 4  ;;  %v456_v21 = vrot.slane %v455_v59, 4  ;;  %v451_v24 = vrot.slane %v450_v18, 2 }
 0x286   :  { %388 = vadd.xlane.f32.xlu0 %v387_v52  ;;  %v430_v12 = vrot.slane %v429_v22, 2  ;;  %v439_v37 = vrot.slane %v438_v26, 1 }
 0x287   :  { %v443_v42 = vadd.f32 %v442_v38, %v441_v14  ;;  %v457_v19 = vadd.f32 %v456_v21, %v455_v59  ;;  %v452_v33 = vadd.f32 %v451_v24, %v450_v18 }
 0x288   :  { %v431_v16 = vadd.f32 %v430_v12, %v429_v22  ;;  %v440_v55 = vadd.f32 %v439_v37, %v438_v26 }
 0x289   :  { %v444_v46 = vrot.slane %v443_v42, 2  ;;  %v458_v25 = vrot.slane %v457_v19, 2  ;;  %v453_v49 = vrot.slane %v452_v33, 1 }
 0x28a   :  { %v432_v31 = vrot.slane %v431_v16, 1 }
 0x28b   :  { %v445_v27 = vadd.f32 %v444_v46, %v443_v42  ;;  %v459_v36 = vadd.f32 %v458_v25, %v457_v19  ;;  %v454_v6 = vadd.f32 %v453_v49, %v452_v33 }
 0x28c   :  { %v433_v48 = vadd.f32 %v432_v31, %v431_v16 }
 0x28d   :  { %v446_v39 = vrot.slane %v445_v27, 1  ;;  %v460_v50 = vrot.slane %v459_v36, 1 }
 0x28f   :  { %v447_v56 = vadd.f32 %v446_v39, %v445_v27  ;;  %v461_v10 = vadd.f32 %v460_v50, %v459_v36 }
 0x30f   :  { %v389_v15 = vpop.xlane.xlu0 %388 }
 0x310   :  { %553 = vrcp.f32 %v389_v15 }
 0x31d   :  { %v554_v45 = vpop.eup %553 }
 0x31e   :  { %v465_v51 = vrot.slane %v554_v45, 1  ;;  %v466_v52 = vrot.slane %v554_v45, 2  ;;  %v467_v53 = vrot.slane %v554_v45, 3  ;;  %v468_v54 = vrot.slane %v554_v45, 4 }
 0x31f   :  { %v469_v57 = vrot.slane %v554_v45, 5  ;;  %v470_v3 = vrot.slane %v554_v45, 6  ;;  %v471_v58 = vrot.slane %v554_v45, 7  ;;  %v480_v4 = vmul.f32 %v554_v45, %v412_v41 }
 0x320   :  { %v481_v61 = vmul.f32 %v465_v51, %v419_v43  ;;  %v482_v62 = vmul.f32 %v466_v52, %v426_v47  ;;  %v483_v35 = vmul.f32 %v467_v53, %v433_v48  ;;  %v484_v0 = vmul.f32 %v468_v54, %v440_v55 }
 0x321   :  { %v485_v9 = vmul.f32 %v469_v57, %v447_v56  ;;  %v486_v13 = vmul.f32 %v470_v3, %v454_v6  ;;  %v487_v34 = vmul.f32 %v471_v58, %v461_v10 }
 0x322   :  { %v496_v14 = vrot.slane %v481_v61, 7  ;;  %v498_v32 = vrot.slane %v482_v62, 6  ;;  %v500_v60 = vrot.slane %v483_v35, 5  ;;  %v502_v63 = vrot.slane %v484_v0, 4 }
 0x323   :  { %v504_v8 = vrot.slane %v485_v9, 3  ;;  %v506_v40 = vrot.slane %v486_v13, 2  ;;  %v508_v5 = vrot.slane %v487_v34, 1 }
 0x324   :  { %v497_v59 = vsel %vm231_vm1, %v496_v14, %v480_v4 }
 0x325   :  { %v499_v38 = vsel %vm233_vm2, %v498_v32, %v497_v59 }
 0x326   :  { %v501_v7 = vsel %vm235_vm3, %v500_v60, %v499_v38 }
 0x327   :  { %v503_v22 = vsel %vm237_vm4, %v502_v63, %v501_v7 }
 0x328   :  { %v505_v21 = vsel %vm239_vm5, %v504_v8, %v503_v22 }
 0x329   :  { %v507_v42 = vsel %vm241_vm6, %v506_v40, %v505_v21 }
 0x32a   :  { %v509_v15 = vsel %vm243_vm7, %v508_v5, %v507_v42 }
 0x32b   :  { %511 = vst.msk [vmem:[#allocation7] sm:$0xff] %vm65_vm0, %v509_v15 }
 0x32c   :  { %606 = shalt.err (!%p603_p0)
}
 0x32d   :  { %521 = dma.vmem_to_hbm [thread:$0]  %s519_s2, 128, %s823_s3, [#allocation4]  }
 0x32e   :  { %619 = dma.done.wait [#allocation4], 128  }
 0x32f   :  { %620 = vsyncadd [#allocation4], 4294967168 }
 0x330   :  { %525 = vsyncpa [#allocation3], 1 }
 0x331   :  { %526 = vsyncpa [#allocation6], 1 }
 0x332   :  { %527 = vsyncpa [#allocation4], 1 }

</bundles_post_ra>
